<compile_context>
chip_gen: v5e
topology: v5e:2x2
jax: 0.10.0
libtpu: 0.0.40
codegen_flags: <defaults>
</compile_context>

<pallas_src>
import jax
import jax.numpy as jnp
from jax import lax
from jax.experimental import pallas as pl
from jax.experimental.pallas import tpu as pltpu


# ----------------------------------------------------------------------------
# Wrapper: builds packed params / selection matrices, one fused pallas_call.
# ----------------------------------------------------------------------------

def pnet_forward(x_nchw, p):
    x = x_nchw.astype(jnp.float32)
    n, cin, h, w = x.shape

    # Static layer geometry (all VALID 3x3 convs; pool is 2x2/2 ceil-mode).
    ho1, wo1 = h - 2, w - 2
    hp1, wp1 = -(-ho1 // 2), -(-wo1 // 2)
    ho2, wo2 = hp1 - 2, wp1 - 2
    ho3, wo3 = ho2 - 2, wo2 - 2

    # "Input aligned" flattened lengths: conv output (y, x) lives at lane
    # y*stride + x of its layer's result, where stride is the *input* width.
    m1 = (ho1 - 1) * w + wo1          # conv1 result length (stride = w)
    lp = hp1 * wp1                    # pool1 compact length (stride = wp1)
    m2 = (ho2 - 1) * wp1 + wo2        # conv2 result length (stride = wp1)
    m3 = (ho3 - 1) * wp1 + wo3        # conv3 / heads result length
    l3 = ho3 * wo3                    # compact output length per image

    # NCHW is already (C, H*W)-contiguous: free reshape, no HBM transpose.
    x_flat = x.reshape(n, cin, h * w)

    # Per-layer parameter slabs, channel-major: [W (Cout, 9*Cin) | b | prelu].
    slab1 = jnp.concatenate([p["w1"].T, p["b1"].T, p["a1"].T], axis=1)   # (10, 29)
    slab2 = jnp.concatenate([p["w2"].T, p["b2"].T, p["a2"].T], axis=1)   # (16, 92)
    slab3 = jnp.concatenate([p["w3"].T, p["b3"].T, p["a3"].T], axis=1)   # (32, 146)
    wh = jnp.concatenate([p["w42"], p["w41"]], axis=1).T                 # (6, 32)
    bh = jnp.concatenate([p["b42"], p["b41"]], axis=1).T                 # (6, 1)
    slabh = jnp.concatenate([wh, bh], axis=1)                            # (6, 33)

    c1, c2, c3 = slab1.shape[0], slab2.shape[0], slab3.shape[0]          # 10,16,32

    # Hoisted selection matrices (pool decimation+compaction; final compaction).
    qp = jnp.arange(lp, dtype=jnp.int32)
    pool_src = 2 * (qp // wp1) * w + 2 * (qp % wp1)
    sel_pool = (jnp.arange(m1, dtype=jnp.int32)[:, None] == pool_src[None, :]
                ).astype(jnp.float32)                                    # (m1, lp)
    qo = jnp.arange(l3, dtype=jnp.int32)
    out_src = (qo // wo3) * wp1 + (qo % wo3)
    sel_out = (jnp.arange(m3, dtype=jnp.int32)[:, None] == out_src[None, :]
               ).astype(jnp.float32)                                     # (m3, l3)

    # Ceil-mode boundary masks (additive -1e30); all-zero for even ho1/wo1.
    col = jnp.arange(m1, dtype=jnp.int32)
    if wo1 % 2 == 1:
        mask_x = jnp.where(col % w == wo1 - 1, -1e30, 0.0)
    else:
        mask_x = jnp.zeros((m1,), jnp.float32)
    if ho1 % 2 == 1:
        mask_y = jnp.where(col // w == ho1 - 1, -1e30, 0.0)
    else:
        mask_y = jnp.zeros((m1,), jnp.float32)
    masks = jnp.stack([mask_x, mask_y]).astype(jnp.float32)              # (2, m1)

    # ---------------- fused kernel (one grid step == one image) ------------
    def kernel(x_ref, l1_ref, l2_ref, l3_ref, lh_ref,
               selp_ref, selo_ref, msk_ref, out_ref):

        def conv_prelu(acts, slab, k_cin, stride, m_out):
            # Whole-layer im2col: 9 lane-shifted slices concatenated on the
            # sublane axis -> ONE (Cout, 9*Cin) x (9*Cin, m_out) MXU matmul.
            wm = slab[:, : 9 * k_cin]
            bb = slab[:, 9 * k_cin: 9 * k_cin + 1]
            aa = slab[:, 9 * k_cin + 1: 9 * k_cin + 2]
            lhs = jnp.concatenate(
                [acts[:, dy * stride + dx: dy * stride + dx + m_out]
                 for dy in range(3) for dx in range(3)], axis=0)
            z = jnp.dot(wm, lhs, preferred_element_type=jnp.float32) + bb
            return jnp.maximum(z, 0.0) + aa * jnp.minimum(z, 0.0)

        x0 = x_ref[...]                                   # (cin, h*w)

        # conv1 (3 -> 10) + PReLU; result aligned with stride w.
        a1 = conv_prelu(x0, l1_ref[...], cin, w, m1)      # (10, m1)

        # pool1: max of 4 lane-shifted copies + one selection matmul.
        msk = msk_ref[...]
        mx = msk[0:1, :]
        my = msk[1:2, :]
        pad = jnp.zeros((c1, w + 1), jnp.float32)         # tail pad, never selected
        a1p = jnp.concatenate([a1, pad], axis=1)          # (10, m1 + w + 1)
        pm = jnp.maximum(
            jnp.maximum(a1, a1p[:, 1: 1 + m1] + mx),
            jnp.maximum(a1p[:, w: w + m1] + my,
                        a1p[:, w + 1: w + 1 + m1] + mx + my))
        pool = jnp.dot(pm, selp_ref[...],
                       preferred_element_type=jnp.float32)               # (10, lp)

        # conv2 (10 -> 16) + PReLU; conv3 (16 -> 32) + PReLU (stride wp1).
        a2 = conv_prelu(pool, l2_ref[...], c1, wp1, m2)   # (16, m2)
        a3 = conv_prelu(a2, l3_ref[...], c2, wp1, m3)     # (32, m3)

        # Fused 1x1 heads: one (6, 32) x (32, m3) matmul; 2-class softmax as a
        # sigmoid of the logit difference (matches softmax limits at extremes).
        lh = lh_ref[...]
        logits = jnp.dot(lh[:, :c3], a3,
                         preferred_element_type=jnp.float32) + lh[:, c3:c3 + 1]
        box = logits[0:4, :]
        d = logits[4:5, :] - logits[5:6, :]
        prob1 = 1.0 / (1.0 + jnp.exp(d))
        prob0 = 1.0 - prob1
        res = jnp.concatenate([box, prob0, prob1], axis=0)               # (6, m3)

        # Compact to NCHW-ready (6, ho3*wo3) with one selection matmul.
        out_ref[...] = jnp.dot(res, selo_ref[...],
                               preferred_element_type=jnp.float32)

    def fixed(shape):
        zeros = (0,) * len(shape)
        return pl.BlockSpec(shape, lambda i: zeros)

    out = pl.pallas_call(
        kernel,
        out_shape=jax.ShapeDtypeStruct((n, 6, l3), jnp.float32),
        grid=(n,),
        in_specs=[
            pl.BlockSpec((None, cin, h * w), lambda i: (i, 0, 0)),   # image i
            fixed(slab1.shape), fixed(slab2.shape), fixed(slab3.shape),
            fixed(slabh.shape),
            fixed(sel_pool.shape), fixed(sel_out.shape), fixed(masks.shape),
        ],
        out_specs=pl.BlockSpec((None, 6, l3), lambda i: (i, 0, 0)),
        compiler_params=pltpu.CompilerParams(
            dimension_semantics=("parallel",),      # dual-TC on v7x; no-op v5e/v6e
        ),
    )(x_flat, slab1, slab2, slab3, slabh, sel_pool, sel_out, masks)

    # Free reshape + channel split; no transposes needed (already NCHW order).
    out = out.reshape(n, 6, ho3, wo3)
    b_out = out[:, 0:4]    # bbox regression, (N, 4, Ho3, Wo3)
    a_out = out[:, 4:6]    # face probs,      (N, 2, Ho3, Wo3)
    return b_out, a_out


# ----------------------------------------------------------------------------
# Parameters (synthetic, deterministic; PReLU slope = 0.25 like torch default).
# Conv weights are stored pre-flattened in (dy, dx, cin) x cout (HWIO) order.
# ----------------------------------------------------------------------------

def init_params(key):
    ks = jax.random.split(key, 10)

    def conv_w(k, kk, cin, cout):
        scale = 1.0 / jnp.sqrt(kk * kk * cin)
        return scale * jax.random.normal(k, (kk * kk * cin, cout), jnp.float32)

    def bias(k, cout):
        return 0.1 * jax.random.normal(k, (1, cout), jnp.float32)

    return {
        "w1": conv_w(ks[0], 3, 3, 10),   "b1": bias(ks[1], 10),
        "a1": 0.25 * jnp.ones((1, 10), jnp.float32),
        "w2": conv_w(ks[2], 3, 10, 16),  "b2": bias(ks[3], 16),
        "a2": 0.25 * jnp.ones((1, 16), jnp.float32),
        "w3": conv_w(ks[4], 3, 16, 32),  "b3": bias(ks[5], 32),
        "a3": 0.25 * jnp.ones((1, 32), jnp.float32),
        "w41": conv_w(ks[6], 1, 32, 2),  "b41": bias(ks[7], 2),
        "w42": conv_w(ks[8], 1, 32, 4),  "b42": bias(ks[9], 4),
    }


# ----------------------------------------------------------------------------
# Pure-JAX reference (lax.conv) for a numerical sanity check.
# ----------------------------------------------------------------------------

def pnet_reference(x_nchw, p):
    x = jnp.transpose(x_nchw, (0, 2, 3, 1)).astype(jnp.float32)

    def conv(x, w_flat, b, k, cin, cout):
        w = w_flat.reshape(k, k, cin, cout)  # HWIO
        y = lax.conv_general_dilated(x, w, (1, 1), "VALID",
                                     dimension_numbers=("NHWC", "HWIO", "NHWC"))
        return y + b.reshape(1, 1, 1, cout)

    def prelu(y, a):
        return jnp.maximum(y, 0.0) + a.reshape(1, 1, 1, -1) * jnp.minimum(y, 0.0)

    y = prelu(conv(x, p["w1"], p["b1"], 3, 3, 10), p["a1"])
    h, w = y.shape[1], y.shape[2]
    pad_h, pad_w = 2 * (-(-h // 2)) - h, 2 * (-(-w // 2)) - w
    y = lax.reduce_window(y, -jnp.inf, lax.max, (1, 2, 2, 1), (1, 2, 2, 1),
                          [(0, 0), (0, pad_h), (0, pad_w), (0, 0)])
    y = prelu(conv(y, p["w2"], p["b2"], 3, 10, 16), p["a2"])
    y = prelu(conv(y, p["w3"], p["b3"], 3, 16, 32), p["a3"])
    a = jax.nn.softmax(conv(y, p["w41"], p["b41"], 1, 32, 2), axis=-1)
    b = conv(y, p["w42"], p["b42"], 1, 32, 4)
    return jnp.transpose(b, (0, 3, 1, 2)), jnp.transpose(a, (0, 3, 1, 2))


if __name__ == "__main__":
    key = jax.random.PRNGKey(0)
    k_x, k_p = jax.random.split(key)

    x = jax.random.normal(k_x, (2, 3, 16, 16), jnp.float32)   # NCHW like torch
    params = init_params(k_p)

    fwd = jax.jit(pnet_forward)
    b_out, a_out = fwd(x, params)
    jax.block_until_ready((b_out, a_out))

    b_ref, a_ref = pnet_reference(x, params)
    assert b_out.shape == (2, 4, 3, 3) and a_out.shape == (2, 2, 3, 3)
    assert jnp.allclose(b_out, b_ref, atol=1e-3, rtol=1e-2)
    assert jnp.allclose(a_out, a_ref, atol=1e-3, rtol=1e-2)

    print("KERNEL_OK")
</pallas_src>

<mosaic_0001>
module attributes {stable_mosaic.version = 11 : i64} {
  func.func @kernel(%arg0: i32, %arg1: memref<1x3x256xf32, #tpu.memory_space<vmem>>, %arg2: memref<10x29xf32, #tpu.memory_space<vmem>>, %arg3: memref<16x92xf32, #tpu.memory_space<vmem>>, %arg4: memref<32x146xf32, #tpu.memory_space<vmem>>, %arg5: memref<6x33xf32, #tpu.memory_space<vmem>>, %arg6: memref<222x49xf32, #tpu.memory_space<vmem>>, %arg7: memref<17x9xf32, #tpu.memory_space<vmem>>, %arg8: memref<2x222xf32, #tpu.memory_space<vmem>>, %arg9: memref<1x6x9xf32, #tpu.memory_space<vmem>>) attributes {dimension_semantics = [#tpu.dimension_semantics<parallel>], iteration_bounds = array<i64: 2>, scalar_prefetch = 0 : i64, scratch_operands = 0 : i64, tpu.core_type = #tpu.core_type<tc>, window_params = [{transform_indices = @transform_0, window_bounds = array<i64: 1, 3, 256>}, {pipeline_mode = #tpu.pipeline_mode<synchronous>, transform_indices = @transform_1, window_bounds = array<i64: 10, 29>}, {pipeline_mode = #tpu.pipeline_mode<synchronous>, transform_indices = @transform_2, window_bounds = array<i64: 16, 92>}, {pipeline_mode = #tpu.pipeline_mode<synchronous>, transform_indices = @transform_3, window_bounds = array<i64: 32, 146>}, {pipeline_mode = #tpu.pipeline_mode<synchronous>, transform_indices = @transform_4, window_bounds = array<i64: 6, 33>}, {pipeline_mode = #tpu.pipeline_mode<synchronous>, transform_indices = @transform_5, window_bounds = array<i64: 222, 49>}, {pipeline_mode = #tpu.pipeline_mode<synchronous>, transform_indices = @transform_6, window_bounds = array<i64: 17, 9>}, {pipeline_mode = #tpu.pipeline_mode<synchronous>, transform_indices = @transform_7, window_bounds = array<i64: 2, 222>}, {transform_indices = @transform_8, window_bounds = array<i64: 1, 6, 9>}]} {
    %c0 = arith.constant 0 : index
    %c0_0 = arith.constant 0 : index
    %c0_1 = arith.constant 0 : index
    %0 = vector.load %arg1[%c0, %c0_0, %c0_1] : memref<1x3x256xf32, #tpu.memory_space<vmem>>, vector<1x3x256xf32>
    %1 = vector.shape_cast %0 : vector<1x3x256xf32> to vector<3x256xf32>
    %c0_2 = arith.constant 0 : index
    %c0_3 = arith.constant 0 : index
    %2 = vector.load %arg2[%c0_2, %c0_3] : memref<10x29xf32, #tpu.memory_space<vmem>>, vector<10x29xf32>
    %3 = vector.extract_strided_slice %2 {offsets = [0, 0], sizes = [10, 27], strides = [1, 1]} : vector<10x29xf32> to vector<10x27xf32>
    %4 = vector.extract_strided_slice %2 {offsets = [0, 27], sizes = [10, 1], strides = [1, 1]} : vector<10x29xf32> to vector<10x1xf32>
    %5 = vector.extract_strided_slice %2 {offsets = [0, 28], sizes = [10, 1], strides = [1, 1]} : vector<10x29xf32> to vector<10x1xf32>
    %6 = vector.extract_strided_slice %1 {offsets = [0, 0], sizes = [3, 222], strides = [1, 1]} : vector<3x256xf32> to vector<3x222xf32>
    %7 = vector.extract_strided_slice %1 {offsets = [0, 1], sizes = [3, 222], strides = [1, 1]} : vector<3x256xf32> to vector<3x222xf32>
    %8 = vector.extract_strided_slice %1 {offsets = [0, 2], sizes = [3, 222], strides = [1, 1]} : vector<3x256xf32> to vector<3x222xf32>
    %9 = vector.extract_strided_slice %1 {offsets = [0, 16], sizes = [3, 222], strides = [1, 1]} : vector<3x256xf32> to vector<3x222xf32>
    %10 = vector.extract_strided_slice %1 {offsets = [0, 17], sizes = [3, 222], strides = [1, 1]} : vector<3x256xf32> to vector<3x222xf32>
    %11 = vector.extract_strided_slice %1 {offsets = [0, 18], sizes = [3, 222], strides = [1, 1]} : vector<3x256xf32> to vector<3x222xf32>
    %12 = vector.extract_strided_slice %1 {offsets = [0, 32], sizes = [3, 222], strides = [1, 1]} : vector<3x256xf32> to vector<3x222xf32>
    %13 = vector.extract_strided_slice %1 {offsets = [0, 33], sizes = [3, 222], strides = [1, 1]} : vector<3x256xf32> to vector<3x222xf32>
    %14 = vector.extract_strided_slice %1 {offsets = [0, 34], sizes = [3, 222], strides = [1, 1]} : vector<3x256xf32> to vector<3x222xf32>
    %15 = tpu.concatenate %6, %7, %8, %9, %10, %11, %12, %13, %14 in 0 : vector<3x222xf32>, vector<3x222xf32>, vector<3x222xf32>, vector<3x222xf32>, vector<3x222xf32>, vector<3x222xf32>, vector<3x222xf32>, vector<3x222xf32>, vector<3x222xf32> -> vector<27x222xf32>
    %cst = arith.constant dense<0.000000e+00> : vector<10x222xf32>
    %16 = tpu.matmul %3, %15, %cst {dimension_numbers = #tpu.dot_dimension_numbers<[1], [0], [0], [1], [0, 0, 1, 1], [], []>} : vector<10x27xf32>, vector<27x222xf32>, vector<10x222xf32> -> vector<10x222xf32>
    %17 = vector.broadcast %4 : vector<10x1xf32> to vector<10x222xf32>
    %18 = arith.addf %16, %17 : vector<10x222xf32>
    %cst_4 = arith.constant 0.000000e+00 : f32
    %19 = vector.broadcast %cst_4 : f32 to vector<10x222xf32>
    %20 = arith.maximumf %18, %19 : vector<10x222xf32>
    %cst_5 = arith.constant 0.000000e+00 : f32
    %21 = vector.broadcast %cst_5 : f32 to vector<10x222xf32>
    %22 = arith.minimumf %18, %21 : vector<10x222xf32>
    %23 = vector.broadcast %5 : vector<10x1xf32> to vector<10x222xf32>
    %24 = arith.mulf %23, %22 : vector<10x222xf32>
    %25 = arith.addf %20, %24 : vector<10x222xf32>
    %c0_6 = arith.constant 0 : index
    %c0_7 = arith.constant 0 : index
    %26 = vector.load %arg8[%c0_6, %c0_7] : memref<2x222xf32, #tpu.memory_space<vmem>>, vector<2x222xf32>
    %27 = vector.extract_strided_slice %26 {offsets = [0, 0], sizes = [1, 222], strides = [1, 1]} : vector<2x222xf32> to vector<1x222xf32>
    %28 = vector.extract_strided_slice %26 {offsets = [1, 0], sizes = [1, 222], strides = [1, 1]} : vector<2x222xf32> to vector<1x222xf32>
    %cst_8 = arith.constant 0.000000e+00 : f32
    %29 = vector.broadcast %cst_8 : f32 to vector<10x17xf32>
    %30 = tpu.concatenate %25, %29 in 1 : vector<10x222xf32>, vector<10x17xf32> -> vector<10x239xf32>
    %31 = vector.extract_strided_slice %30 {offsets = [0, 1], sizes = [10, 222], strides = [1, 1]} : vector<10x239xf32> to vector<10x222xf32>
    %32 = vector.broadcast %27 : vector<1x222xf32> to vector<10x222xf32>
    %33 = arith.addf %31, %32 : vector<10x222xf32>
    %34 = arith.maximumf %25, %33 : vector<10x222xf32>
    %35 = vector.extract_strided_slice %30 {offsets = [0, 16], sizes = [10, 222], strides = [1, 1]} : vector<10x239xf32> to vector<10x222xf32>
    %36 = vector.broadcast %28 : vector<1x222xf32> to vector<10x222xf32>
    %37 = arith.addf %35, %36 : vector<10x222xf32>
    %38 = vector.extract_strided_slice %30 {offsets = [0, 17], sizes = [10, 222], strides = [1, 1]} : vector<10x239xf32> to vector<10x222xf32>
    %39 = vector.broadcast %27 : vector<1x222xf32> to vector<10x222xf32>
    %40 = arith.addf %38, %39 : vector<10x222xf32>
    %41 = vector.broadcast %28 : vector<1x222xf32> to vector<10x222xf32>
    %42 = arith.addf %40, %41 : vector<10x222xf32>
    %43 = arith.maximumf %37, %42 : vector<10x222xf32>
    %44 = arith.maximumf %34, %43 : vector<10x222xf32>
    %c0_9 = arith.constant 0 : index
    %c0_10 = arith.constant 0 : index
    %45 = vector.load %arg6[%c0_9, %c0_10] : memref<222x49xf32, #tpu.memory_space<vmem>>, vector<222x49xf32>
    %cst_11 = arith.constant dense<0.000000e+00> : vector<10x49xf32>
    %46 = tpu.matmul %44, %45, %cst_11 {dimension_numbers = #tpu.dot_dimension_numbers<[1], [0], [0], [1], [0, 0, 1, 1], [], []>} : vector<10x222xf32>, vector<222x49xf32>, vector<10x49xf32> -> vector<10x49xf32>
    %c0_12 = arith.constant 0 : index
    %c0_13 = arith.constant 0 : index
    %47 = vector.load %arg3[%c0_12, %c0_13] : memref<16x92xf32, #tpu.memory_space<vmem>>, vector<16x92xf32>
    %48 = vector.extract_strided_slice %47 {offsets = [0, 0], sizes = [16, 90], strides = [1, 1]} : vector<16x92xf32> to vector<16x90xf32>
    %49 = vector.extract_strided_slice %47 {offsets = [0, 90], sizes = [16, 1], strides = [1, 1]} : vector<16x92xf32> to vector<16x1xf32>
    %50 = vector.extract_strided_slice %47 {offsets = [0, 91], sizes = [16, 1], strides = [1, 1]} : vector<16x92xf32> to vector<16x1xf32>
    %51 = vector.extract_strided_slice %46 {offsets = [0, 0], sizes = [10, 33], strides = [1, 1]} : vector<10x49xf32> to vector<10x33xf32>
    %52 = vector.extract_strided_slice %46 {offsets = [0, 1], sizes = [10, 33], strides = [1, 1]} : vector<10x49xf32> to vector<10x33xf32>
    %53 = vector.extract_strided_slice %46 {offsets = [0, 2], sizes = [10, 33], strides = [1, 1]} : vector<10x49xf32> to vector<10x33xf32>
    %54 = vector.extract_strided_slice %46 {offsets = [0, 7], sizes = [10, 33], strides = [1, 1]} : vector<10x49xf32> to vector<10x33xf32>
    %55 = vector.extract_strided_slice %46 {offsets = [0, 8], sizes = [10, 33], strides = [1, 1]} : vector<10x49xf32> to vector<10x33xf32>
    %56 = vector.extract_strided_slice %46 {offsets = [0, 9], sizes = [10, 33], strides = [1, 1]} : vector<10x49xf32> to vector<10x33xf32>
    %57 = vector.extract_strided_slice %46 {offsets = [0, 14], sizes = [10, 33], strides = [1, 1]} : vector<10x49xf32> to vector<10x33xf32>
    %58 = vector.extract_strided_slice %46 {offsets = [0, 15], sizes = [10, 33], strides = [1, 1]} : vector<10x49xf32> to vector<10x33xf32>
    %59 = vector.extract_strided_slice %46 {offsets = [0, 16], sizes = [10, 33], strides = [1, 1]} : vector<10x49xf32> to vector<10x33xf32>
    %60 = tpu.concatenate %51, %52, %53, %54, %55, %56, %57, %58, %59 in 0 : vector<10x33xf32>, vector<10x33xf32>, vector<10x33xf32>, vector<10x33xf32>, vector<10x33xf32>, vector<10x33xf32>, vector<10x33xf32>, vector<10x33xf32>, vector<10x33xf32> -> vector<90x33xf32>
    %cst_14 = arith.constant dense<0.000000e+00> : vector<16x33xf32>
    %61 = tpu.matmul %48, %60, %cst_14 {dimension_numbers = #tpu.dot_dimension_numbers<[1], [0], [0], [1], [0, 0, 1, 1], [], []>} : vector<16x90xf32>, vector<90x33xf32>, vector<16x33xf32> -> vector<16x33xf32>
    %62 = vector.broadcast %49 : vector<16x1xf32> to vector<16x33xf32>
    %63 = arith.addf %61, %62 : vector<16x33xf32>
    %cst_15 = arith.constant 0.000000e+00 : f32
    %64 = vector.broadcast %cst_15 : f32 to vector<16x33xf32>
    %65 = arith.maximumf %63, %64 : vector<16x33xf32>
    %cst_16 = arith.constant 0.000000e+00 : f32
    %66 = vector.broadcast %cst_16 : f32 to vector<16x33xf32>
    %67 = arith.minimumf %63, %66 : vector<16x33xf32>
    %68 = vector.broadcast %50 : vector<16x1xf32> to vector<16x33xf32>
    %69 = arith.mulf %68, %67 : vector<16x33xf32>
    %70 = arith.addf %65, %69 : vector<16x33xf32>
    %c0_17 = arith.constant 0 : index
    %c0_18 = arith.constant 0 : index
    %71 = vector.load %arg4[%c0_17, %c0_18] : memref<32x146xf32, #tpu.memory_space<vmem>>, vector<32x146xf32>
    %72 = vector.extract_strided_slice %71 {offsets = [0, 0], sizes = [32, 144], strides = [1, 1]} : vector<32x146xf32> to vector<32x144xf32>
    %73 = vector.extract_strided_slice %71 {offsets = [0, 144], sizes = [32, 1], strides = [1, 1]} : vector<32x146xf32> to vector<32x1xf32>
    %74 = vector.extract_strided_slice %71 {offsets = [0, 145], sizes = [32, 1], strides = [1, 1]} : vector<32x146xf32> to vector<32x1xf32>
    %75 = vector.extract_strided_slice %70 {offsets = [0, 0], sizes = [16, 17], strides = [1, 1]} : vector<16x33xf32> to vector<16x17xf32>
    %76 = vector.extract_strided_slice %70 {offsets = [0, 1], sizes = [16, 17], strides = [1, 1]} : vector<16x33xf32> to vector<16x17xf32>
    %77 = vector.extract_strided_slice %70 {offsets = [0, 2], sizes = [16, 17], strides = [1, 1]} : vector<16x33xf32> to vector<16x17xf32>
    %78 = vector.extract_strided_slice %70 {offsets = [0, 7], sizes = [16, 17], strides = [1, 1]} : vector<16x33xf32> to vector<16x17xf32>
    %79 = vector.extract_strided_slice %70 {offsets = [0, 8], sizes = [16, 17], strides = [1, 1]} : vector<16x33xf32> to vector<16x17xf32>
    %80 = vector.extract_strided_slice %70 {offsets = [0, 9], sizes = [16, 17], strides = [1, 1]} : vector<16x33xf32> to vector<16x17xf32>
    %81 = vector.extract_strided_slice %70 {offsets = [0, 14], sizes = [16, 17], strides = [1, 1]} : vector<16x33xf32> to vector<16x17xf32>
    %82 = vector.extract_strided_slice %70 {offsets = [0, 15], sizes = [16, 17], strides = [1, 1]} : vector<16x33xf32> to vector<16x17xf32>
    %83 = vector.extract_strided_slice %70 {offsets = [0, 16], sizes = [16, 17], strides = [1, 1]} : vector<16x33xf32> to vector<16x17xf32>
    %84 = tpu.concatenate %75, %76, %77, %78, %79, %80, %81, %82, %83 in 0 : vector<16x17xf32>, vector<16x17xf32>, vector<16x17xf32>, vector<16x17xf32>, vector<16x17xf32>, vector<16x17xf32>, vector<16x17xf32>, vector<16x17xf32>, vector<16x17xf32> -> vector<144x17xf32>
    %cst_19 = arith.constant dense<0.000000e+00> : vector<32x17xf32>
    %85 = tpu.matmul %72, %84, %cst_19 {dimension_numbers = #tpu.dot_dimension_numbers<[1], [0], [0], [1], [0, 0, 1, 1], [], []>} : vector<32x144xf32>, vector<144x17xf32>, vector<32x17xf32> -> vector<32x17xf32>
    %86 = vector.broadcast %73 : vector<32x1xf32> to vector<32x17xf32>
    %87 = arith.addf %85, %86 : vector<32x17xf32>
    %cst_20 = arith.constant 0.000000e+00 : f32
    %88 = vector.broadcast %cst_20 : f32 to vector<32x17xf32>
    %89 = arith.maximumf %87, %88 : vector<32x17xf32>
    %cst_21 = arith.constant 0.000000e+00 : f32
    %90 = vector.broadcast %cst_21 : f32 to vector<32x17xf32>
    %91 = arith.minimumf %87, %90 : vector<32x17xf32>
    %92 = vector.broadcast %74 : vector<32x1xf32> to vector<32x17xf32>
    %93 = arith.mulf %92, %91 : vector<32x17xf32>
    %94 = arith.addf %89, %93 : vector<32x17xf32>
    %c0_22 = arith.constant 0 : index
    %c0_23 = arith.constant 0 : index
    %95 = vector.load %arg5[%c0_22, %c0_23] : memref<6x33xf32, #tpu.memory_space<vmem>>, vector<6x33xf32>
    %96 = vector.extract_strided_slice %95 {offsets = [0, 0], sizes = [6, 32], strides = [1, 1]} : vector<6x33xf32> to vector<6x32xf32>
    %cst_24 = arith.constant dense<0.000000e+00> : vector<6x17xf32>
    %97 = tpu.matmul %96, %94, %cst_24 {dimension_numbers = #tpu.dot_dimension_numbers<[1], [0], [0], [1], [0, 0, 1, 1], [], []>} : vector<6x32xf32>, vector<32x17xf32>, vector<6x17xf32> -> vector<6x17xf32>
    %98 = vector.extract_strided_slice %95 {offsets = [0, 32], sizes = [6, 1], strides = [1, 1]} : vector<6x33xf32> to vector<6x1xf32>
    %99 = vector.broadcast %98 : vector<6x1xf32> to vector<6x17xf32>
    %100 = arith.addf %97, %99 : vector<6x17xf32>
    %101 = vector.extract_strided_slice %100 {offsets = [0, 0], sizes = [4, 17], strides = [1, 1]} : vector<6x17xf32> to vector<4x17xf32>
    %102 = vector.extract_strided_slice %100 {offsets = [4, 0], sizes = [1, 17], strides = [1, 1]} : vector<6x17xf32> to vector<1x17xf32>
    %103 = vector.extract_strided_slice %100 {offsets = [5, 0], sizes = [1, 17], strides = [1, 1]} : vector<6x17xf32> to vector<1x17xf32>
    %104 = arith.subf %102, %103 : vector<1x17xf32>
    %105 = math.exp %104 : vector<1x17xf32>
    %cst_25 = arith.constant 1.000000e+00 : f32
    %106 = vector.broadcast %cst_25 : f32 to vector<1x17xf32>
    %107 = arith.addf %106, %105 : vector<1x17xf32>
    %cst_26 = arith.constant 1.000000e+00 : f32
    %108 = vector.broadcast %cst_26 : f32 to vector<1x17xf32>
    %109 = arith.divf %108, %107 : vector<1x17xf32>
    %cst_27 = arith.constant 1.000000e+00 : f32
    %110 = vector.broadcast %cst_27 : f32 to vector<1x17xf32>
    %111 = arith.subf %110, %109 : vector<1x17xf32>
    %112 = tpu.concatenate %101, %111, %109 in 0 : vector<4x17xf32>, vector<1x17xf32>, vector<1x17xf32> -> vector<6x17xf32>
    %c0_28 = arith.constant 0 : index
    %c0_29 = arith.constant 0 : index
    %113 = vector.load %arg7[%c0_28, %c0_29] : memref<17x9xf32, #tpu.memory_space<vmem>>, vector<17x9xf32>
    %cst_30 = arith.constant dense<0.000000e+00> : vector<6x9xf32>
    %114 = tpu.matmul %112, %113, %cst_30 {dimension_numbers = #tpu.dot_dimension_numbers<[1], [0], [0], [1], [0, 0, 1, 1], [], []>} : vector<6x17xf32>, vector<17x9xf32>, vector<6x9xf32> -> vector<6x9xf32>
    %c0_31 = arith.constant 0 : index
    %c0_32 = arith.constant 0 : index
    %c0_33 = arith.constant 0 : index
    %115 = vector.load %arg9[%c0_31, %c0_32, %c0_33] : memref<1x6x9xf32, #tpu.memory_space<vmem>>, vector<1x6x9xf32>
    %116 = vector.shape_cast %115 : vector<1x6x9xf32> to vector<6x9xf32>
    %117 = vector.shape_cast %114 : vector<6x9xf32> to vector<1x6x9xf32>
    tpu.vector_store %arg9[%c0_31, %c0_32, %c0_33], %117 {strides = array<i32>} : memref<1x6x9xf32, #tpu.memory_space<vmem>>, vector<1x6x9xf32>,
    return
  }
  func.func @transform_0(%arg0: i32) -> (i32, i32, i32) {
    %c0_i32 = arith.constant 0 : i32
    %c0_i32_0 = arith.constant 0 : i32
    %c0_i32_1 = arith.constant 0 : i32
    return %arg0, %c0_i32, %c0_i32_0 : i32, i32, i32
  }
  func.func @transform_1(%arg0: i32) -> (i32, i32) {
    %c0_i32 = arith.constant 0 : i32
    %c0_i32_0 = arith.constant 0 : i32
    %c0_i32_1 = arith.constant 0 : i32
    return %c0_i32, %c0_i32_0 : i32, i32
  }
  func.func @transform_2(%arg0: i32) -> (i32, i32) {
    %c0_i32 = arith.constant 0 : i32
    %c0_i32_0 = arith.constant 0 : i32
    %c0_i32_1 = arith.constant 0 : i32
    return %c0_i32, %c0_i32_0 : i32, i32
  }
  func.func @transform_3(%arg0: i32) -> (i32, i32) {
    %c0_i32 = arith.constant 0 : i32
    %c0_i32_0 = arith.constant 0 : i32
    %c0_i32_1 = arith.constant 0 : i32
    return %c0_i32, %c0_i32_0 : i32, i32
  }
  func.func @transform_4(%arg0: i32) -> (i32, i32) {
    %c0_i32 = arith.constant 0 : i32
    %c0_i32_0 = arith.constant 0 : i32
    %c0_i32_1 = arith.constant 0 : i32
    return %c0_i32, %c0_i32_0 : i32, i32
  }
  func.func @transform_5(%arg0: i32) -> (i32, i32) {
    %c0_i32 = arith.constant 0 : i32
    %c0_i32_0 = arith.constant 0 : i32
    %c0_i32_1 = arith.constant 0 : i32
    return %c0_i32, %c0_i32_0 : i32, i32
  }
  func.func @transform_6(%arg0: i32) -> (i32, i32) {
    %c0_i32 = arith.constant 0 : i32
    %c0_i32_0 = arith.constant 0 : i32
    %c0_i32_1 = arith.constant 0 : i32
    return %c0_i32, %c0_i32_0 : i32, i32
  }
  func.func @transform_7(%arg0: i32) -> (i32, i32) {
    %c0_i32 = arith.constant 0 : i32
    %c0_i32_0 = arith.constant 0 : i32
    %c0_i32_1 = arith.constant 0 : i32
    return %c0_i32, %c0_i32_0 : i32, i32
  }
  func.func @transform_8(%arg0: i32) -> (i32, i32, i32) {
    %c0_i32 = arith.constant 0 : i32
    %c0_i32_0 = arith.constant 0 : i32
    %c0_i32_1 = arith.constant 0 : i32
    return %arg0, %c0_i32, %c0_i32_0 : i32, i32, i32
  }
}

</mosaic_0001>

<bundles_post_ra>
// kernel: pnet_forward.1
= control target key start
LH: loop header
LB: loop body
LE: loop exit
PB: predicated region body
PF: predicated region fallthrough
CT: control target
= control target key end

     0   :  { %s1449_s27 = smov 0   ;;  %s1768_s0 = inlined_call_operand.vmem [shape: f32[2,3,256], index: 0, kind: input, shape index: {}]   ;;  %s1769_s1 = inlined_call_operand.vmem [shape: f32[10,29], index: 1, kind: input, shape index: {}]   ;;  %s1770_s2 = inlined_call_operand.vmem [shape: f32[16,92], index: 2, kind: input, shape index: {}]   ;;  %s1771_s3 = inlined_call_operand.vmem [shape: f32[32,146], index: 3, kind: input, shape index: {}]   ;;  %s1772_s4 = inlined_call_operand.vmem [shape: f32[6,33], index: 4, kind: input, shape index: {}]   ;;  %s1773_s5 = inlined_call_operand.vmem [shape: f32[222,49], index: 5, kind: input, shape index: {}]   ;;  %s1774_s6 = inlined_call_operand.vmem [shape: f32[17,9], index: 6, kind: input, shape index: {}]   ;;  %s1775_s7 = inlined_call_operand.vmem [shape: f32[2,222], index: 7, kind: input, shape index: {}]   ;;  %s1776_s8 = inlined_call_operand.vmem [shape: f32[2,6,9], index: 8, kind: output, shape index: {}]  }
   0x1 LB: > { %s1177_s28 = sadd.s32 4294967295, %s1379_s27   ;;  %p1181_p0 = scmp.ge.s32.totalorder %s1379_s27, 1  ;;  %s1379_s27 = sphi %s1449_s27, %s18_s27  }
   0x2   : > { %p262_p1 = scmp.lt.s32.totalorder %s1379_s27, 3 }
   0x4   : > { %p263_p2 = pnand %p1181_p0, %p262_p1 }
   0x5   : > { %p295_p3 = scmp.lt.s32.totalorder (!%p263_p2), %s1177_s28, 1  ;;  %s1381_s11 = smov (!%p263_p2), 126  }
   0x6   : > { %266 = sbr.rel (%p263_p2) target bundleno = 1638 (0x666), region = 52  ;;  %s1382_s12 = smov (!%p263_p2), 110  }
   0x7   : > { %s1383_s13 = smov (!%p263_p2), 112   ;;  %s1384_s14 = smov (!%p263_p2), 96  }
   0x8   : > { %s1385_s15 = smov (!%p263_p2), 127   ;;  %s1386_s16 = smov (!%p263_p2), 95  }
   0x9   : > { %s1387_s17 = smov (!%p263_p2), 94   ;;  %s1388_s18 = smov (!%p263_p2), 111  }
   0xa   : > { %s1391_s25 = smov (!%p263_p2), 17   ;;  %s1392_s26 = smov (!%p263_p2), 1  }
   0xb   : > { %s1778_s28 = smov (!%p295_p3, %s1177_s28), 1  ;;  %v1475_v39 = vld [vmem:[%s1769_s1] sm:$0xff]  ;;  %v1389_v40 = vmov 28   ;;  %v1390_v41 = vmov 27   ;;  %v1487_v48 = vld [vmem:[%s1769_s1 + $0x8] sm:$0x3] }
   0xc   : > { %s1206_s29 = sshll.u32 %s1778_s28, 3  ;;  %1274 = vset.pattern.permute.xlu1 %v1389_v40  ;;  %1273 = vset.pattern.permute.xlu0 %v1390_v41  ;;  %v522_v43 = vld [vmem:[%s1775_s7] sm:$0xf]  ;;  %vm373_vm0 = vcmask 900096   ;;  %vm386_vm1 = vcmask 785408   ;;  %vm427_vm2 = vcmask 1041408  }
   0xd   : > { %s299_s10 = scalar_lea.vmem %s1768_s0, %s1206_s29  ;;  %1275 = vset.pattern.permute.xlu2 %v1390_v41  ;;  %v526_v45 = vperm.slane %v522_v43, 0  ;;  %v568_v46 = vperm.slane %v522_v43, 1  ;;  %v569_v50 = vperm.slane %v522_v43, 3  ;;  %v527_v59 = vperm.slane %v522_v43, 2  ;;  %s1393_s30 = smov 16  }
   0xe   : > { %v304_v0 = vld [vmem:[%s299_s10] sm:$0x77]  ;;  %vm399_vm3 = vcmask 777216   ;;  %vm410_vm4 = vcmask 769024   ;;  %vm430_vm5 = vcmask 1044480   ;;  %vm412_vm6 = vcmask 1042432  }
   0xf   : > { %308 = vst [vmem:[#allocation1] ss:$2 sm:$0xff] %v304_v0  ;;  %v530_v47 = vperm.slane %v526_v45, 0  ;;  %v1489_v49 = vperm.slane %v568_v46, 1  ;;  %v573_v58 = vperm.slane %v569_v50, 1  ;;  %v531_v60 = vperm.slane %v527_v59, 0 }
  0x10   : > { %vm335_vm7 = vcmask 1031168   ;;  %vm348_vm8 = vcmask 916480   ;;  %vm322_vm9 = vcmask 1039360   ;;  %vm418_vm10 = vcmask 1040384   ;;  %s1394_s20 = smov 113   ;;  %s1395_s21 = smov 119  }
  0x11   : > { %vm421_vm11 = vcmask 1043456   ;;  %vm360_vm12 = vcmask 908288   ;;  %vm424_vm13 = vcmask 1046528   ;;  %vm415_vm14 = vcmask 1045504   ;;  %s1396_s22 = smov 114   ;;  %s1397_s23 = smov 120  }
  0x12   : > { %vm443_vm15 = vcmask 220160   ;;  %s1398_s24 = smov 121  }
  0x16   : > { %v1465_v1 = vld.sshfl [vmem:[#allocation1] sm:$0xff pattern:$0x75316420]  ;;  %v1467_v2 = vld.sshfl [vmem:[#allocation1 + $0x8] sm:$0xff pattern:$0x75316420] }
  0x17   : > { %313 = vst [vmem:[#allocation1] ss:$2 sm:$0xff] %v304_v0 }
  0x1e   : > { %v314_v3 = vld.sshfl [vmem:[#allocation1] sm:$0xff pattern:$0x75316420]  ;;  %v315_v4 = vld.sshfl [vmem:[#allocation1 + $0x8] sm:$0xff pattern:$0x75316420] }
  0x1f   : > { %326 = vst [vmem:[#allocation1] ss:$2 sm:$0xff] %v304_v0  ;;  %v316_v26 = vrot.slane %v314_v3, 5  ;;  %v317_v27 = vrot.slane %v315_v4, 5 }
  0x21   : > { %v1268_v29 = vpack.i.bf16 %v317_v27, %v316_v26 }
  0x26   : > { %v327_v5 = vld.sshfl [vmem:[#allocation1] sm:$0xff pattern:$0x75316420]  ;;  %v328_v6 = vld.sshfl [vmem:[#allocation1 + $0x8] sm:$0xff pattern:$0x75316420] }
  0x27   : > { %339 = vst [vmem:[#allocation1] ss:$2 sm:$0xff] %v304_v0  ;;  %v329_v11 = vrot.slane %v327_v5, 2  ;;  %v330_v12 = vrot.slane %v328_v6, 2 }
  0x29   : > { %v1238_v15 = vpack.i.bf16 %v330_v12, %v329_v11 }
  0x2b   : > { %1239 = vrot.lane.b32.xlu2 %v1238_v15, %s1381_s11 }
  0x2e   : > { %v340_v7 = vld.sshfl [vmem:[#allocation1] sm:$0xff pattern:$0x75316420]  ;;  %v341_v8 = vld.sshfl [vmem:[#allocation1 + $0x8] sm:$0xff pattern:$0x75316420] }
  0x2f   : > { %353 = vst [vmem:[#allocation1 + $0x1] ss:$2 sm:$0xff] %v304_v0  ;;  %v342_v19 = vrot.slane %v340_v7, 7  ;;  %v343_v20 = vrot.slane %v341_v8, 7 }
  0x31   : > { %v1243_v23 = vpack.i.bf16 %v343_v20, %v342_v19 }
  0x33   : > { %1244 = vrot.lane.b32.xlu2 %v1243_v23, %s1383_s13 }
  0x36   : > { %v354_v9 = vld.sshfl [vmem:[#allocation1] sm:$0xff pattern:$0x75316420]  ;;  %v355_v10 = vld.sshfl [vmem:[#allocation1 + $0x8] sm:$0xff pattern:$0x75316420] }
  0x37   : > { %364 = vst [vmem:[#allocation1] ss:$2 sm:$0xff] %v304_v0  ;;  %v1263_v37 = vpack.i.bf16 %v355_v10, %v354_v9 }
  0x3b   : > { %1269 = vrot.lane.b32.xlu2 %v1268_v29, %s1385_s15 }
  0x3e   : > { %v365_v13 = vld.sshfl [vmem:[#allocation1] sm:$0xff pattern:$0x75316420]  ;;  %v366_v14 = vld.sshfl [vmem:[#allocation1 + $0x8] sm:$0xff pattern:$0x75316420] }
  0x3f   : > { %v367_v16 = vrot.slane %v365_v13, 1  ;;  %v368_v17 = vrot.slane %v366_v14, 1  ;;  %377 = vst [vmem:[#allocation1] ss:$2 sm:$0xff] %v304_v0 }
  0x41   : > { %v1248_v18 = vpack.i.bf16 %v368_v17, %v367_v16 }
  0x43   : > { %1249 = vrot.lane.b32.xlu0 %v1248_v18, %s1382_s12  ;;  %440 = vperm.xlu2 %1275, %v1487_v48  }
  0x46   : > { %v378_v21 = vld.sshfl [vmem:[#allocation1] sm:$0xff pattern:$0x75316420]  ;;  %v379_v22 = vld.sshfl [vmem:[#allocation1 + $0x8] sm:$0xff pattern:$0x75316420] }
  0x47   : > { %v380_v24 = vrot.slane %v378_v21, 6  ;;  %v381_v25 = vrot.slane %v379_v22, 6  ;;  %390 = vst [vmem:[#allocation1] ss:$2 sm:$0xff] %v304_v0 }
  0x49   : > { %v1253_v28 = vpack.i.bf16 %v381_v25, %v380_v24 }
  0x4b   : > { %1254 = vrot.lane.b32.xlu0 %v1253_v28, %s1384_s14  ;;  %1276 = vset.pattern.permute.xlu2 %v1389_v40 }
  0x4c   : > { %590 = vrot.lane.b32.xlu2 %v531_v60, %s1391_s25 }
  0x4e   : > { %v391_v30 = vld.sshfl [vmem:[#allocation1] sm:$0xff pattern:$0x75316420]  ;;  %v392_v31 = vld.sshfl [vmem:[#allocation1 + $0x8] sm:$0xff pattern:$0x75316420] }
  0x4f   : > { %403 = vst [vmem:[#allocation1] ss:$2 sm:$0xff] %v304_v0  ;;  %v393_v32 = vrot.slane %v391_v30, 3  ;;  %v394_v33 = vrot.slane %v392_v31, 3 }
  0x51   : > { %v1258_v34 = vpack.i.bf16 %v394_v33, %v393_v32 }
  0x53   : > { %1259 = vrot.lane.b32.xlu0 %v1258_v34, %s1386_s16 }
  0x54   : > { %511 = vperm.xlu2 %1276, %v1487_v48  }
  0x56   : > { %v404_v35 = vld.sshfl [vmem:[#allocation1] sm:$0xff pattern:$0x75316420]  ;;  %v405_v36 = vld.sshfl [vmem:[#allocation1 + $0x8] sm:$0xff pattern:$0x75316420] }
  0x57   : > { %406 = vrot.lane.b32.xlu1 %v404_v35, %s1387_s17 }
  0x5b   : > { %435 = vperm.xlu0 %1273, %v1475_v39  }
  0x5c   : > { %576 = vrot.lane.b32.xlu2 %v1489_v49, %s1393_s30 }
  0x5f   : > { %408 = vrot.lane.b32.xlu1 %v405_v36, %s1387_s17  ;;  %s303_s17 = scalar_lea.vmem %s1776_s8, %s1206_s29 }
  0x63   : > { %600 = vrot.lane.b32.xlu0 %v1489_v49, %s1391_s25 }
  0x67   : > { %1264 = vrot.lane.b32.xlu1 %v1263_v37, %s1388_s18 }
  0x6b   : > { %534 = vrot.lane.b32.xlu0 %v530_v47, %s1392_s26 }
  0x6f   : > { %507 = vperm.xlu1 %1274, %v1475_v39  }
  0x73   : > { %578 = vrot.lane.b32.xlu0 %v573_v58, %s1393_s30 }
  0x77   : > { %588 = vrot.lane.b32.xlu1 %v530_v47, %s1391_s25 }
  0x7f   : > { %602 = vrot.lane.b32.xlu1 %v573_v58, %s1391_s25 }
  0x85   : > { %v1479_v42 = vpop.permute.xlu2 %1239 }
  0x86   : > { %v1242_v11 = vunpack.i.h.bf16 %v1479_v42  ;;  %v1241_v12 = vunpack.i.l.bf16 %v1479_v42 }
  0x87   : > { %536 = vrot.lane.b32.xlu1 %v531_v60, %s1392_s26 }
  0x88   : > { %v336_v17 = vsel %vm335_vm7, %v1241_v12, %v1242_v11 }
  0x8d   : > { %v1245_v53 = vpop.permute.xlu2 %1244 }
  0x8e   : > { %v1247_v13 = vunpack.i.h.bf16 %v1245_v53  ;;  %v1246_v14 = vunpack.i.l.bf16 %v1245_v53 }
  0x90   : > { %v349_v18 = vsel %vm348_vm8, %v1246_v14, %v1247_v13  ;;  %v420_v23 = vsel %vm418_vm10, %v1242_v11, %v1247_v13 }
  0x91   : > { %v419_v27 = vsel %vm418_vm10, %v336_v17, %v349_v18 }
  0x95   : > { %v1270_v8 = vpop.permute.xlu2 %1269 }
  0x96   : > { %v1272_v15 = vunpack.i.h.bf16 %v1270_v8  ;;  %v1271_v16 = vunpack.i.l.bf16 %v1270_v8 }
  0x98   : > { %v323_v22 = vsel %vm322_vm9, %v1271_v16, %v1272_v15  ;;  %v414_v24 = vsel %vm412_vm6, %v1467_v2, %v1272_v15 }
  0x99   : > { %v413_v30 = vsel %vm412_vm6, %v1465_v1, %v323_v22  ;;  %v417_v2 = vsel %vm415_vm14, %v414_v24, %v1242_v11 }
  0x9a   : > { %v416_v32 = vsel %vm415_vm14, %v413_v30, %v336_v17  ;;  %v680_v30 = vld [vmem:[%s1773_s5 + $0xc8] sm:$0xff] }
  0x9d   : > { %v441_v33 = vpop.permute.xlu2 %440 }
  0xa6   : > { %v591_v40 = vpop.permute.xlu2 %590 }
  0xb5   : > { %v1250_v38 = vpop.permute.xlu0 %1249 }
  0xb6   : > { %v1493_v51 = vunpack.i.h.bf16 %v1250_v38  ;;  %v1251_v52 = vunpack.i.l.bf16 %v1250_v38 }
  0xb8   : > { %v374_v63 = vsel %vm373_vm0, %v1251_v52, %v1493_v51  ;;  %vm592_vm0 = vcmask 138240  }
  0xbd   : > { %v1255_v44 = vpop.permute.xlu0 %1254 }
  0xbe   : > { %v1257_v55 = vunpack.i.h.bf16 %v1255_v44  ;;  %v1256_v56 = vunpack.i.l.bf16 %v1255_v44 }
  0xc0   : > { %v387_v0 = vsel %vm386_vm1, %v1256_v56, %v1257_v55  ;;  %v429_v3 = vsel %vm427_vm2, %v1493_v51, %v1257_v55  ;;  %vm538_vm1 = vcmask 7168  }
  0xc1   : > { %v428_v6 = vsel %vm427_vm2, %v374_v63, %v387_v0 }
  0xc5   : > { %v1260_v57 = vpop.permute.xlu0 %1259 }
  0xc6   : > { %v1262_v61 = vunpack.i.h.bf16 %v1260_v57  ;;  %v1261_v62 = vunpack.i.l.bf16 %v1260_v57 }
  0xc8   : > { %v400_v5 = vsel %vm399_vm3, %v1261_v62, %v1262_v61  ;;  %v432_v9 = vsel %vm430_vm5, %v429_v3, %v1262_v61  ;;  %v512_v61 = vpop.permute.xlu2 %511  ;;  %vm580_vm3 = vcmask 130048  }
  0xc9   : > { %v407_v54 = vpop.permute.xlu1 %406  ;;  %v431_v10 = vsel %vm430_vm5, %v428_v6, %v400_v5 }
  0xcd   : > { %v436_v34 = vpop.permute.xlu0 %435 }
  0xd0   : > { %v577_v22 = vpop.permute.xlu2 %576 }
  0xd1   : > { %v409_v4 = vpop.permute.xlu1 %408 }
  0xd2   : > { %1188 = vmatpush.msk.msra.mxu1 %vm412_vm6, %v409_v4  ;;  %v411_v7 = vsel %vm410_vm4, %v407_v54, %v409_v4 }
  0xd3   : > { %1185 = vmatpush.msk.msra.mxu0 %vm412_vm6, %v411_v7 }
  0xd4   : > { %488 = vmatpush.msra.mxu1 %v432_v9 }
  0xd5   : > { %465 = vmatpush.msra.mxu0 %v431_v10  ;;  %v601_v47 = vpop.permute.xlu0 %600 }
  0xd9   : > { %v1265_v19 = vpop.permute.xlu1 %1264 }
  0xda   : > { %v1267_v20 = vunpack.i.h.bf16 %v1265_v19  ;;  %v1266_v21 = vunpack.i.l.bf16 %v1265_v19 }
  0xdc   : > { %v423_v25 = vsel %vm421_vm11, %v420_v23, %v1267_v20  ;;  %v361_v26 = vsel %vm360_vm12, %v1266_v21, %v1267_v20 }
  0xdd   : > { %v426_v28 = vsel %vm424_vm13, %v423_v25, %v1493_v51  ;;  %v422_v29 = vsel %vm421_vm11, %v419_v27, %v361_v26  ;;  %v535_v9 = vpop.permute.xlu0 %534 }
  0xde   : > { %489 = vmatpush.msra.mxu1 %v426_v28  ;;  %v425_v31 = vsel %vm424_vm13, %v422_v29, %v374_v63  ;;  %v682_v28 = vld [vmem:[%s1773_s5 + $0xd8] sm:$0x3f]  ;;  %v681_v29 = vld [vmem:[%s1773_s5 + $0xd0] sm:$0xff] }
  0xdf   : > { %466 = vmatpush.msra.mxu0 %v425_v31  ;;  %1191 = vmatpush.msk.msra.mxu3 %vm415_vm14, %v682_v28  ;;  %v679_v31 = vld [vmem:[%s1773_s5 + $0xc0] sm:$0xff] }
  0xe0   : > { %490 = vmatpush.msra.mxu1 %v417_v2  ;;  %v678_v2 = vld [vmem:[%s1773_s5 + $0xb8] sm:$0xff] }
  0xe1   : > { %467 = vmatpush.msra.mxu0 %v416_v32  ;;  %1189 = vmatmul.msk.f32.vlgmr.msra.gmra.mxu1 %vm443_vm15, %v1475_v39  ;;  %v508_v1 = vpop.permute.xlu1 %507 }
  0xe2   : > { %1186 = vmatmul.msk.f32.vlgmr.msra.gmra.mxu0 %vm443_vm15, %v1475_v39  ;;  %720 = vmatpush.msra.mxu3 %v681_v29 }
  0xe4   : > { %721 = vmatpush.msra.mxu3 %v680_v30 }
  0xe5   : > { %v579_v23 = vpop.permute.xlu0 %578 }
  0xe6   : > { %v581_v24 = vsel %vm580_vm3, %v577_v22, %v579_v23  ;;  %722 = vmatpush.msra.mxu3 %v679_v31 }
  0xe8   : > { %723 = vmatpush.msra.mxu3 %v678_v2 }
  0xe9   : > { %1190 = vmatmul.msk.f32.gmra.mxu1 %vm443_vm15, %v1487_v48  ;;  %v589_v35 = vpop.permute.xlu1 %588 }
  0xea   : > { %1187 = vmatmul.msk.f32.gmra.mxu0 %vm443_vm15, %v1487_v48  ;;  %v593_v52 = vsel %vm592_vm0, %v589_v35, %v591_v40 }
  0xf1   : > { %v603_v48 = vpop.permute.xlu1 %602 }
  0xf2   : > { %v604_v53 = vsel %vm592_vm0, %v601_v47, %v603_v48  ;;  %v671_v48 = vld [vmem:[%s1773_s5 + $0x80] sm:$0xff] }
  0xf9   : > { %v537_v18 = vpop.permute.xlu1 %536 }
  0xfa   : > { %v539_v19 = vsel %vm538_vm1, %v535_v9, %v537_v18 }
 0x15e   : > { %v492_v36 = vpop.f32.mrf.mxu1 }
 0x15f   : > { %v493_v37 = vadd.f32 %v492_v36, %v436_v34  ;;  %v469_v38 = vpop.f32.mrf.mxu0  ;;  %v676_v36 = vld [vmem:[%s1773_s5 + $0xa8] sm:$0xff] }
 0x160   : > { %v470_v41 = vadd.f32 %v469_v38, %v436_v34  ;;  %v677_v34 = vld [vmem:[%s1773_s5 + $0xb0] sm:$0xff] }
 0x161   : > { %v503_v42 = vmin.f32 %v493_v37, 0.0  ;;  %v499_v44 = vmax.f32 %v493_v37, 0.0  ;;  %724 = vmatpush.msra.mxu3 %v677_v34  ;;  %v675_v37 = vld [vmem:[%s1773_s5 + $0xa0] sm:$0xff] }
 0x162   : > { %v502_v43 = vmin.f32 %v470_v41, 0.0  ;;  %v498_v46 = vmax.f32 %v470_v41, 0.0  ;;  %v674_v41 = vld [vmem:[%s1773_s5 + $0x98] sm:$0xff] }
 0x163   : > { %v515_v45 = vmul.f32 %v508_v1, %v503_v42  ;;  %725 = vmatpush.msra.mxu3 %v676_v36 }
 0x164   : > { %v514_v39 = vmul.f32 %v508_v1, %v502_v43 }
 0x165   : > { %v1525_v49 = vadd.f32 %v515_v45, %v499_v44  ;;  %726 = vmatpush.msra.mxu3 %v675_v37 }
 0x166   : > { %v1527_v50 = vadd.f32 %v514_v39, %v498_v46  ;;  %v495_v51 = vpop.f32.mrf.mxu1  ;;  %v673_v46 = vld [vmem:[%s1773_s5 + $0x90] sm:$0xff] }
 0x167   : > { %v523_v54 = vsel %vm410_vm4, %v1525_v49, 0.0  ;;  %v496_v55 = vadd.f32 %v495_v51, %v441_v33  ;;  %v472_v56 = vpop.f32.mrf.mxu0  ;;  %727 = vmatpush.msra.mxu3 %v674_v41  ;;  %v670_v51 = vld [vmem:[%s1773_s5 + $0x78] sm:$0xff] }
 0x168   : > { %v473_v57 = vadd.f32 %v472_v56, %v441_v33  ;;  %v597_v58 = vadd.f32 %v593_v52, %v523_v54  ;;  %v596_v60 = vadd.f32 %v589_v35, %v1527_v50  ;;  %v542_v13 = vadd.f32 %v535_v9, %v1527_v50  ;;  %692 = vmatpush.msra.mxu2 %v670_v51  ;;  %v665_v56 = vld [vmem:[%s1773_s5 + $0x50] sm:$0xff] }
 0x169   : > { %v505_v59 = vmin.f32 %v496_v55, 0.0  ;;  %v501_v0 = vmax.f32 %v496_v55, 0.0  ;;  %v543_v20 = vadd.f32 %v539_v19, %v523_v54  ;;  %v585_v25 = vadd.f32 %v581_v24, %v523_v54  ;;  %728 = vmatpush.msra.mxu3 %v673_v46  ;;  %v667_v54 = vld [vmem:[%s1773_s5 + $0x60] sm:$0xff]  ;;  %v666_v55 = vld [vmem:[%s1773_s5 + $0x58] sm:$0xff]  ;;  %v739_v46 = vld [vmem:[%s1770_s2 + $0x8] sm:$0xff] }
 0x16a   : > { %v504_v62 = vmin.f32 %v473_v57, 0.0  ;;  %v608_v63 = vadd.f32 %v604_v53, %v597_v58  ;;  %v607_v4 = vadd.f32 %v601_v47, %v596_v60  ;;  %v500_v5 = vmax.f32 %v473_v57, 0.0 }
 0x16b   : > { %v517_v3 = vmul.f32 %v512_v61, %v505_v59  ;;  %v584_v32 = vadd.f32 %v577_v22, %v1527_v50  ;;  %v1400_v51 = vmov 91  }
 0x16c   : > { %v516_v6 = vmul.f32 %v512_v61, %v504_v62  ;;  %617 = vrot.lane.b32.xlu2 %v608_v63, %s1385_s15  ;;  %615 = vrot.lane.b32.xlu1 %v607_v4, %s1385_s15  ;;  %v664_v62 = vld [vmem:[%s1773_s5 + $0x48] sm:$0xff]  ;;  %v663_v63 = vld [vmem:[%s1773_s5 + $0x40] sm:$0xff] }
 0x16d   : > { %v1535_v7 = vadd.f32 %v517_v3, %v501_v0  ;;  %v662_v0 = vld [vmem:[%s1773_s5 + $0x38] sm:$0xff]  ;;  %v660_v3 = vld [vmem:[%s1773_s5 + $0x28] sm:$0xff]  ;;  %v659_v4 = vld [vmem:[%s1773_s5 + $0x20] sm:$0xff]  ;;  %1319 = vset.pattern.permute.xlu2 %v1400_v51 }
 0x16e   : > { %v1538_v8 = vadd.f32 %v516_v6, %v500_v5  ;;  %v658_v5 = vld [vmem:[%s1773_s5 + $0x18] sm:$0xff]  ;;  %v657_v6 = vld [vmem:[%s1773_s5 + $0x10] sm:$0xff] }
 0x16f   : > { %v524_v10 = vsel %vm410_vm4, %v1535_v7, 0.0 }
 0x170   : > { %v598_v11 = vadd.f32 %v589_v35, %v1538_v8  ;;  %v599_v12 = vadd.f32 %v593_v52, %v524_v10  ;;  %v544_v14 = vadd.f32 %v535_v9, %v1538_v8  ;;  %v545_v21 = vadd.f32 %v539_v19, %v524_v10  ;;  %v669_v52 = vld [vmem:[%s1773_s5 + $0x70] sm:$0xff]  ;;  %v656_v9 = vld [vmem:[%s1773_s5 + $0x8] sm:$0xff] }
 0x171   : > { %v587_v40 = vadd.f32 %v581_v24, %v524_v10  ;;  %v586_v42 = vadd.f32 %v577_v22, %v1538_v8  ;;  %693 = vmatpush.msra.mxu2 %v669_v52  ;;  %v655_v10 = vld [vmem:[%s1773_s5] sm:$0xff] }
 0x172   : > { %v609_v15 = vadd.f32 %v601_v47, %v598_v11  ;;  %v610_v16 = vadd.f32 %v604_v53, %v599_v12  ;;  %v1277_v17 = vpack.i.bf16 %v544_v14, %v542_v13  ;;  %v672_v47 = vld [vmem:[%s1773_s5 + $0x88] sm:$0xff] }
 0x173   : > { %729 = vmatpush.msra.mxu3 %v672_v47  ;;  %v668_v53 = vld [vmem:[%s1773_s5 + $0x68] sm:$0xff] }
 0x174   : > { %619 = vrot.lane.b32.xlu0 %v609_v15, %s1385_s15  ;;  %1278 = vrot.lane.b32.xlu2 %v1277_v17, %s1385_s15 }
 0x175   : > { %621 = vrot.lane.b32.xlu1 %v610_v16, %s1385_s15  ;;  %730 = vmatpush.msra.mxu3 %v671_v48 }
 0x176   : > { %694 = vmatpush.msra.mxu2 %v668_v53 }
 0x178   : > { %695 = vmatpush.msra.mxu2 %v667_v54 }
 0x17a   : > { %696 = vmatpush.msra.mxu2 %v666_v55 }
 0x17c   : > { %552 = vrot.lane.b32.xlu0 %v543_v20, %s1385_s15  ;;  %697 = vmatpush.msra.mxu2 %v665_v56 }
 0x17e   : > { %698 = vmatpush.msra.mxu2 %v664_v62 }
 0x180   : > { %699 = vmatpush.msra.mxu2 %v663_v63 }
 0x182   : > { %700 = vmatpush.msra.mxu2 %v662_v0 }
 0x184   : > { %556 = vrot.lane.b32.xlu0 %v545_v21, %s1385_s15 }
 0x1c6   : > { %v618_v26 = vpop.permute.xlu2 %617 }
 0x1c7   : > { %v630_v27 = vmax.f32 %v585_v25, %v618_v26 }
 0x1c9   : > { %639 = vrot.lane.b32.xlu2 %v630_v27, %s1383_s13 }
 0x1ce   : > { %v1279_v57 = vpop.permute.xlu2 %1278 }
 0x1cf   : > { %v1280_v15 = vunpack.i.l.bf16 %v1279_v57  ;;  %v1281_v21 = vunpack.i.h.bf16 %v1279_v57 }
 0x1de   : > { %v616_v1 = vpop.permute.xlu1 %615 }
 0x1df   : > { %v623_v33 = vsel %vm322_vm9, %v616_v1, %v618_v26 }
 0x1e0   : > { %v629_v35 = vmax.f32 %v584_v32, %v623_v33 }
 0x1e2   : > { %637 = vrot.lane.b32.xlu1 %v629_v35, %s1383_s13 }
 0x1e6   : > { %v620_v38 = vpop.permute.xlu0 %619 }
 0x1e7   : > { %v622_v43 = vpop.permute.xlu1 %621 }
 0x1e8   : > { %v624_v44 = vsel %vm322_vm9, %v620_v38, %v622_v43  ;;  %v632_v45 = vmax.f32 %v587_v40, %v622_v43 }
 0x1e9   : > { %v631_v39 = vmax.f32 %v586_v42, %v624_v44  ;;  %v738_v44 = vld [vmem:[%s1770_s2] sm:$0xff] }
 0x1ea   : > { %643 = vrot.lane.b32.xlu2 %v632_v45, %s1383_s13  ;;  %v1399_v45 = vmov 90  }
 0x1eb   : > { %641 = vrot.lane.b32.xlu1 %v631_v39, %s1383_s13  ;;  %1317 = vset.pattern.permute.xlu0 %v1399_v45 }
 0x1ec   : > { %1318 = vset.pattern.permute.xlu1 %v1399_v45 }
 0x1ee   : > { %v553_v58 = vpop.permute.xlu0 %552 }
 0x1ef   : > { %v565_v59 = vmax.f32 %v1525_v49, %v553_v58  ;;  %v661_v49 = vld [vmem:[%s1773_s5 + $0x30] sm:$0xff]  ;;  %v558_v16 = vsel %vm322_vm9, %v1280_v15, %v553_v58 }
 0x1f0   : > { %701 = vmatpush.msra.mxu2 %v661_v49  ;;  %v564_v17 = vmax.f32 %v1527_v50, %v558_v16 }
 0x1f2   : > { %702 = vmatpush.msra.mxu2 %v660_v3 }
 0x1f4   : > { %703 = vmatpush.msra.mxu2 %v659_v4 }
 0x1f6   : > { %704 = vmatpush.msra.mxu2 %v658_v5  ;;  %v557_v11 = vpop.permute.xlu0 %556 }
 0x1f7   : > { %v567_v12 = vmax.f32 %v1535_v7, %v557_v11  ;;  %v559_v22 = vsel %vm322_vm9, %v1281_v21, %v557_v11 }
 0x1f8   : > { %705 = vmatpush.msra.mxu2 %v657_v6  ;;  %v566_v23 = vmax.f32 %v1538_v8, %v559_v22 }
 0x1fa   : > { %706 = vmatpush.msra.mxu2 %v656_v9 }
 0x1fc   : > { %707 = vmatpush.msra.mxu2 %v655_v10 }
 0x223   : > { %v640_v60 = vpop.permute.xlu2 %639 }
 0x224   : > { %v652_v61 = vmax.f32 %v565_v59, %v640_v60 }
 0x226   : > { %1192 = vmatmul.msk.f32.vlgmr.msra.gmra.mxu3 %vm410_vm4, %v652_v61 }
 0x244   : > { %v644_v13 = vpop.permute.xlu2 %643 }
 0x245   : > { %v654_v14 = vmax.f32 %v567_v12, %v644_v13 }
 0x247   : > { %1193 = vmatmul.msk.f32.gmra.mxu3 %vm410_vm4, %v654_v14  ;;  %vm814_vm4 = vcmask 736256  }
 0x254   : > { %v638_v18 = vpop.permute.xlu1 %637 }
 0x255   : > { %v645_v19 = vsel %vm348_vm8, %v638_v18, %v640_v60 }
 0x256   : > { %v651_v20 = vmax.f32 %v564_v17, %v645_v19 }
 0x258   : > { %708 = vmatmul.f32.vlgmr.msra.gmra.mxu2 %v651_v20 }
 0x25d   : > { %v642_v7 = vpop.permute.xlu1 %641 }
 0x25e   : > { %v646_v24 = vsel %vm348_vm8, %v642_v7, %v644_v13 }
 0x25f   : > { %v653_v25 = vmax.f32 %v566_v23, %v646_v24 }
 0x261   : > { %711 = vmatmul.f32.gmra.mxu2 %v653_v25 }
 0x2a9   : > { %v732_v26 = vpop.f32.mrf.mxu3 }
 0x2ca   : > { %v735_v50 = vpop.f32.mrf.mxu3 }
 0x2db   : > { %v709_v27 = vpop.f32.mrf.mxu2 }
 0x2dc   : > { %v1654_v28 = vadd.f32 %v732_v26, %v709_v27 }
 0x2de   : > { %793 = vrot.lane.b32.xlu1 %v1654_v28, %s1383_s13  ;;  %v760_v31 = vrot.slane %v1654_v28, 2  ;;  %v742_v2 = vrot.slane %v1654_v28, 6  ;;  %v751_v33 = vrot.slane %v1654_v28, 4 }
 0x2e4   : > { %v712_v29 = vpop.f32.mrf.mxu2 }
 0x2e5   : > { %v1658_v30 = vadd.f32 %v735_v50, %v712_v29 }
 0x2e7   : > { %795 = vrot.lane.b32.xlu0 %v1658_v30, %s1383_s13  ;;  %v761_v8 = vrot.slane %v1658_v30, 2  ;;  %v743_v32 = vrot.slane %v1658_v30, 6  ;;  %v752_v1 = vrot.slane %v1658_v30, 4  ;;  %v1292_v41 = vpack.i.bf16 %v1654_v28, %v1658_v30 }
 0x2e9   : > { %v762_v34 = vsel %vm415_vm14, %v760_v31, %v761_v8  ;;  %v744_v35 = vsel %vm427_vm2, %v742_v2, %v743_v32  ;;  %v753_v38 = vsel %vm421_vm11, %v751_v33, %v752_v1  ;;  %v1401_v32 = vmov 16   ;;  %v863_v1 = vld [vmem:[%s1771_s3 + $0x18] sm:$0xff] }
 0x2ea   : > { %v1282_v36 = vpack.i.bf16 %v760_v31, %v762_v34  ;;  %v1297_v37 = vpack.i.bf16 %v742_v2, %v744_v35  ;;  %v1287_v40 = vpack.i.bf16 %v751_v33, %v753_v38  ;;  %v1712_v2 = vld [vmem:[%s1771_s3 + $0x38] sm:$0xff] }
 0x2ec   : > { %1283 = vrot.lane.b32.xlu2 %v1282_v36, %s1394_s20  ;;  %1298 = vrot.lane.b32.xlu1 %v1297_v37, %s1395_s21 }
 0x2ef   : > { %1288 = vrot.lane.b32.xlu0 %v1287_v40, %s1396_s22 }
 0x2f4   : > { %1293 = vrot.lane.b32.xlu2 %v1292_v41, %s1397_s23  ;;  %1308 = vrot.lane.b32.xlu1 %v1287_v40, %s1381_s11  ;;  %v865_v40 = vld [vmem:[%s1771_s3 + $0x28] sm:$0xff] }
 0x2f7   : > { %1303 = vrot.lane.b32.xlu0 %v1282_v36, %s1398_s24 }
 0x2fc   : > { %1313 = vrot.lane.b32.xlu2 %v1297_v37, %s1385_s15  ;;  %806 = vperm.xlu1 %1318, %v738_v44  }
 0x2ff   : > { %811 = vperm.xlu0 %1317, %v739_v46  }
 0x304   : > { %1320 = vset.pattern.permute.xlu1 %v1400_v51  ;;  %853 = vperm.xlu2 %1319, %v739_v46  }
 0x305   : > { %849 = vperm.xlu1 %1320, %v738_v44  }
 0x307   : > { %1363 = vset.pattern.permute.xlu0 %v1401_v32 }
 0x30c   : > { %1362 = vset.pattern.permute.xlu2 %v1401_v32 }
 0x30d   : > { %1361 = vset.pattern.permute.xlu1 %v1401_v32 }
 0x346   : > { %v1284_v42 = vpop.permute.xlu2 %1283 }
 0x347   : > { %v1285_v47 = vunpack.i.l.bf16 %v1284_v42  ;;  %v1286_v54 = vunpack.i.h.bf16 %v1284_v42  ;;  %v861_v42 = vld [vmem:[%s1771_s3 + $0x8] sm:$0xff] }
 0x34e   : > { %v1294_v52 = vpop.permute.xlu2 %1293 }
 0x34f   : > { %v1295_v60 = vunpack.i.l.bf16 %v1294_v52  ;;  %v1296_v49 = vunpack.i.h.bf16 %v1294_v52 }
 0x350   : > { %v794_v43 = vpop.permute.xlu1 %793 }
 0x356   : > { %v1314_v5 = vpop.permute.xlu2 %1313 }
 0x357   : > { %v1316_v10 = vunpack.i.h.bf16 %v1314_v5  ;;  %v1315_v11 = vunpack.i.l.bf16 %v1314_v5 }
 0x359   : > { %v796_v39 = vpop.permute.xlu0 %795  ;;  %v798_v14 = vsel %vm427_vm2, %v1658_v30, %v1316_v10 }
 0x35a   : > { %1194 = vmatpush.msk.msrb.mxu0 %vm427_vm2, %v796_v39 }
 0x35c   : > { %826 = vmatpush.msrb.mxu0 %v794_v43 }
 0x35e   : > { %827 = vmatpush.msrb.mxu0 %v1285_v47  ;;  %v1299_v48 = vpop.permute.xlu1 %1298  ;;  %v854_v23 = vpop.permute.xlu2 %853 }
 0x35f   : > { %v1301_v57 = vunpack.i.h.bf16 %v1299_v48  ;;  %v1300_v58 = vunpack.i.l.bf16 %v1299_v48 }
 0x361   : > { %v1289_v53 = vpop.permute.xlu0 %1288  ;;  %v801_v62 = vsel %vm427_vm2, %v1295_v60, %v1301_v57  ;;  %v862_v60 = vld [vmem:[%s1771_s3 + $0x10] sm:$0xff]  ;;  %vm1042_vm2 = vcmask 261120  }
 0x362   : > { %v1291_v55 = vunpack.i.h.bf16 %v1289_v53  ;;  %v1290_v56 = vunpack.i.l.bf16 %v1289_v53 }
 0x364   : > { %v803_v59 = vsel %vm415_vm14, %v1290_v56, %v1286_v54  ;;  %v802_v61 = vsel %vm421_vm11, %v1300_v58, %v1291_v55 }
 0x365   : > { %828 = vmatpush.msrb.mxu0 %v803_v59  ;;  %v860_v59 = vld [vmem:[%s1771_s3] sm:$0xff] }
 0x366   : > { %v1309_v63 = vpop.permute.xlu1 %1308 }
 0x367   : > { %829 = vmatpush.msrb.mxu0 %v802_v61  ;;  %v1311_v6 = vunpack.i.h.bf16 %v1309_v63  ;;  %v1310_v9 = vunpack.i.l.bf16 %v1309_v63  ;;  %v864_v61 = vld [vmem:[%s1771_s3 + $0x20] sm:$0xff] }
 0x369   : > { %v1304_v0 = vpop.permute.xlu0 %1303  ;;  %830 = vmatpush.msrb.mxu0 %v801_v62  ;;  %v799_v13 = vsel %vm421_vm11, %v1315_v11, %v1311_v6  ;;  %v866_v62 = vld [vmem:[%s1771_s3 + $0x30] sm:$0xff]  ;;  %v1036_v6 = vld [vmem:[%s1772_s4] sm:$0x3f] }
 0x36a   : > { %v1306_v3 = vunpack.i.h.bf16 %v1304_v0  ;;  %v1305_v4 = vunpack.i.l.bf16 %v1304_v0 }
 0x36b   : > { %831 = vmatpush.msrb.mxu0 %v1296_v49 }
 0x36c   : > { %v800_v12 = vsel %vm415_vm14, %v1310_v9, %v1306_v3  ;;  %v1403_v9 = vmov 32  }
 0x36d   : > { %832 = vmatpush.msrb.mxu0 %v1305_v4 }
 0x36e   : > { %v807_v15 = vpop.permute.xlu1 %806 }
 0x36f   : > { %833 = vmatpush.msrb.mxu0 %v800_v12 }
 0x371   : > { %834 = vmatpush.msrb.mxu0 %v799_v13  ;;  %v812_v18 = vpop.permute.xlu0 %811 }
 0x373   : > { %835 = vmatpush.msrb.mxu0 %v798_v14 }
 0x375   : > { %836 = vmatpush.msrb.mxu0 %v1654_v28 }
 0x376   : > { %1195 = vmatmul.msk.f32.vlgmr.msrb.gmra.mxu0 %vm814_vm4, %v738_v44  ;;  %v1402_v44 = vmov 17  }
 0x377   : > { %v850_v20 = vpop.permute.xlu1 %849 }
 0x37e   : > { %1196 = vmatmul.msk.f32.gmra.mxu0 %vm814_vm4, %v739_v46 }
 0x3f3   : > { %v838_v16 = vpop.f32.mrf.mxu0 }
 0x3f4   : > { %v839_v17 = vadd.f32 %v838_v16, %v807_v15 }
 0x3f6   : > { %v846_v19 = vmin.f32 %v839_v17, 0.0  ;;  %v844_v25 = vmax.f32 %v839_v17, 0.0 }
 0x3f8   : > { %v856_v7 = vmul.f32 %v850_v20, %v846_v19 }
 0x3fa   : > { %v1695_v50 = vadd.f32 %v856_v7, %v844_v25 }
 0x3fb   : > { %v841_v21 = vpop.f32.mrf.mxu0 }
 0x3fc   : > { %v842_v22 = vadd.f32 %v841_v21, %v812_v18 }
 0x3fe   : > { %v847_v24 = vmin.f32 %v842_v22, 0.0  ;;  %v845_v26 = vmax.f32 %v842_v22, 0.0 }
 0x400   : > { %v857_v27 = vmul.f32 %v854_v23, %v847_v24 }
 0x402   : > { %v1697_v29 = vadd.f32 %v857_v27, %v845_v26 }
 0x404   : > { %v1331_v28 = vpack.i.bf16 %v1695_v50, %v1697_v29 }
 0x406   : > { %1332 = vrot.lane.b32.xlu1 %v1331_v28, %s1395_s21  ;;  %1327 = vrot.lane.b32.xlu0 %v1331_v28, %s1396_s22 }
 0x407   : > { %1322 = vrot.lane.b32.xlu2 %v1331_v28, %s1394_s20 }
 0x40e   : > { %1347 = vrot.lane.b32.xlu1 %v1331_v28, %s1381_s11  ;;  %1342 = vrot.lane.b32.xlu0 %v1331_v28, %s1398_s24 }
 0x40f   : > { %1337 = vrot.lane.b32.xlu2 %v1331_v28, %s1397_s23 }
 0x416   : > { %1357 = vrot.lane.b32.xlu0 %v1331_v28, %s1383_s13  ;;  %935 = vperm.xlu1 %1361, %v1712_v2  }
 0x417   : > { %1352 = vrot.lane.b32.xlu2 %v1331_v28, %s1385_s15 }
 0x41e   : > { %925 = vperm.xlu0 %1363, %v863_v1   ;;  %920 = vperm.xlu1 %1361, %v861_v42  }
 0x41f   : > { %930 = vperm.xlu2 %1362, %v865_v40  }
 0x426   : > { %1366 = vset.pattern.permute.xlu0 %v1402_v44  ;;  %1365 = vset.pattern.permute.xlu1 %v1402_v44 }
 0x427   : > { %1013 = vperm.xlu0 %1366, %v861_v42   ;;  %1364 = vset.pattern.permute.xlu2 %v1402_v44 }
 0x428   : > { %1025 = vperm.xlu2 %1364, %v1712_v2   ;;  %1021 = vperm.xlu1 %1365, %v865_v40  }
 0x42f   : > { %1368 = vset.pattern.permute.xlu0 %v1403_v9 }
 0x430   : > { %1017 = vperm.xlu2 %1364, %v863_v1   ;;  %1367 = vset.pattern.permute.xlu1 %v1403_v9 }
 0x431   : > { %1039 = vperm.xlu1 %1367, %v1036_v6  }
 0x461   : > { %v1323_v30 = vpop.permute.xlu2 %1322 }
 0x462   : > { %v1324_v31 = vunpack.i.l.bf16 %v1323_v30  ;;  %v1325_v8 = vunpack.i.h.bf16 %v1323_v30 }
 0x464   : > { %946 = vmatpush.msrb.mxu1 %v1324_v31 }
 0x466   : > { %947 = vmatpush.msrb.mxu1 %v1325_v8 }
 0x469   : > { %v1338_v38 = vpop.permute.xlu2 %1337 }
 0x46a   : > { %v1339_v45 = vunpack.i.l.bf16 %v1338_v38  ;;  %v1340_v46 = vunpack.i.h.bf16 %v1338_v38 }
 0x471   : > { %v1353_v54 = vpop.permute.xlu2 %1352 }
 0x472   : > { %v1354_v57 = vunpack.i.l.bf16 %v1353_v54  ;;  %v1355_v58 = vunpack.i.h.bf16 %v1353_v54 }
 0x478   : > { %v1328_v33 = vpop.permute.xlu0 %1327  ;;  %v1333_v35 = vpop.permute.xlu1 %1332 }
 0x479   : > { %v1329_v34 = vunpack.i.l.bf16 %v1328_v33  ;;  %v1330_v36 = vunpack.i.h.bf16 %v1328_v33  ;;  %v1334_v37 = vunpack.i.l.bf16 %v1333_v35  ;;  %v1335_v41 = vunpack.i.h.bf16 %v1333_v35  ;;  %v931_v5 = vpop.permute.xlu2 %930 }
 0x47b   : > { %948 = vmatpush.msrb.mxu1 %v1329_v34 }
 0x47d   : > { %949 = vmatpush.msrb.mxu1 %v1330_v36 }
 0x47f   : > { %950 = vmatpush.msrb.mxu1 %v1334_v37 }
 0x480   : > { %v1343_v43 = vpop.permute.xlu0 %1342  ;;  %v1348_v47 = vpop.permute.xlu1 %1347 }
 0x481   : > { %951 = vmatpush.msrb.mxu1 %v1335_v41  ;;  %v1344_v39 = vunpack.i.l.bf16 %v1343_v43  ;;  %v1345_v48 = vunpack.i.h.bf16 %v1343_v43  ;;  %v1349_v52 = vunpack.i.l.bf16 %v1348_v47  ;;  %v1350_v55 = vunpack.i.h.bf16 %v1348_v47  ;;  %v1095_v43 = vld [vmem:[%s1774_s6 + $0x10] sm:$0x1] }
 0x482   : > { %v1026_v15 = vpop.permute.xlu2 %1025  ;;  %1202 = vmatpush.msk.msrb.mxu2 %vm418_vm10, %v1095_v43  ;;  %vm1122_vm10 = vcmask 70656  }
 0x483   : > { %952 = vmatpush.msrb.mxu1 %v1339_v45  ;;  %v1094_v45 = vld [vmem:[%s1774_s6 + $0x8] sm:$0xff] }
 0x484   : > { %1116 = vmatpush.msrb.mxu2 %v1094_v45 }
 0x485   : > { %953 = vmatpush.msrb.mxu1 %v1340_v46 }
 0x487   : > { %954 = vmatpush.msrb.mxu1 %v1344_v39  ;;  %v1093_v39 = vld [vmem:[%s1774_s6] sm:$0xff] }
 0x488   : > { %v1358_v51 = vpop.permute.xlu0 %1357  ;;  %v936_v4 = vpop.permute.xlu1 %935  ;;  %1117 = vmatpush.msrb.mxu2 %v1093_v39 }
 0x489   : > { %955 = vmatpush.msrb.mxu1 %v1345_v48  ;;  %v1359_v53 = vunpack.i.l.bf16 %v1358_v51  ;;  %v1360_v56 = vunpack.i.h.bf16 %v1358_v51 }
 0x48b   : > { %956 = vmatpush.msrb.mxu1 %v1349_v52  ;;  %989 = vmatpush.msrb.mxu3 %v1359_v53 }
 0x48d   : > { %957 = vmatpush.msrb.mxu1 %v1350_v55  ;;  %990 = vmatpush.msrb.mxu3 %v1360_v56 }
 0x48e   : > { %1197 = vmatmul.msk.f32.vlgmr.msrb.gmra.mxu3 %vm580_vm3, %v861_v42 }
 0x48f   : > { %958 = vmatpush.msrb.mxu1 %v1354_v57 }
 0x490   : > { %v926_v12 = vpop.permute.xlu0 %925  ;;  %v921_v14 = vpop.permute.xlu1 %920 }
 0x491   : > { %959 = vmatpush.msrb.mxu1 %v1355_v58 }
 0x493   : > { %960 = vmatpush.msrb.mxu1 %v1697_v29 }
 0x495   : > { %961 = vmatpush.msrb.mxu1 %v1695_v50  ;;  %v1018_v50 = vpop.permute.xlu2 %1017 }
 0x496   : > { %962 = vmatmul.f32.vlgmr.msrb.gmra.mxu1 %v860_v59  ;;  %1198 = vmatmul.msk.f32.gmra.mxu3 %vm580_vm3, %v863_v1 }
 0x499   : > { %v1014_v8 = vpop.permute.xlu0 %1013 }
 0x49a   : > { %v1022_v25 = vpop.permute.xlu1 %1021 }
 0x49e   : > { %965 = vmatmul.f32.gmra.mxu1 %v862_v60  ;;  %1199 = vmatmul.msk.f32.gmra.mxu3 %vm580_vm3, %v865_v40 }
 0x4a3   : > { %v1040_v40 = vpop.permute.xlu1 %1039 }
 0x4a6   : > { %968 = vmatmul.f32.gmra.mxu1 %v864_v61  ;;  %1200 = vmatmul.msk.f32.gmra.mxu3 %vm580_vm3, %v1712_v2 }
 0x4ae   : > { %971 = vmatmul.f32.gmra.mxu1 %v866_v62 }
 0x511   : > { %v992_v63 = vpop.f32.mrf.mxu3 }
 0x513   : > { %v963_v0 = vpop.f32.mrf.mxu1 }
 0x514   : > { %v964_v17 = vadd.f32 %v963_v0, %v921_v14 }
 0x516   : > { %v993_v23 = vadd.f32 %v992_v63, %v964_v17 }
 0x518   : > { %v1008_v29 = vmin.f32 %v993_v23, 0.0  ;;  %v1004_v36 = vmax.f32 %v993_v23, 0.0 }
 0x519   : > { %v995_v49 = vpop.f32.mrf.mxu3 }
 0x51a   : > { %v1028_v33 = vmul.f32 %v1014_v8, %v1008_v29 }
 0x51b   : > { %v966_v3 = vpop.f32.mrf.mxu1 }
 0x51c   : > { %v967_v16 = vadd.f32 %v966_v3, %v926_v12  ;;  %v1032_v38 = vadd.f32 %v1028_v33, %v1004_v36 }
 0x51e   : > { %v996_v21 = vadd.f32 %v995_v49, %v967_v16 }
 0x520   : > { %v1009_v26 = vmin.f32 %v996_v21, 0.0  ;;  %v1005_v34 = vmax.f32 %v996_v21, 0.0 }
 0x521   : > { %v998_v10 = vpop.f32.mrf.mxu3 }
 0x522   : > { %v1029_v2 = vmul.f32 %v1018_v50, %v1009_v26 }
 0x523   : > { %v969_v11 = vpop.f32.mrf.mxu1 }
 0x524   : > { %v970_v13 = vadd.f32 %v969_v11, %v931_v5  ;;  %v1033_v37 = vadd.f32 %v1029_v2, %v1005_v34 }
 0x526   : > { %v999_v18 = vadd.f32 %v998_v10, %v970_v13 }
 0x528   : > { %v1010_v7 = vmin.f32 %v999_v18, 0.0  ;;  %v1006_v32 = vmax.f32 %v999_v18, 0.0 }
 0x529   : > { %v1001_v20 = vpop.f32.mrf.mxu3 }
 0x52a   : > { %v1030_v28 = vmul.f32 %v1022_v25, %v1010_v7 }
 0x52b   : > { %v972_v19 = vpop.f32.mrf.mxu1 }
 0x52c   : > { %v973_v22 = vadd.f32 %v972_v19, %v936_v4  ;;  %v1034_v35 = vadd.f32 %v1030_v28, %v1006_v32 }
 0x52e   : > { %v1002_v24 = vadd.f32 %v1001_v20, %v973_v22 }
 0x530   : > { %v1011_v27 = vmin.f32 %v1002_v24, 0.0  ;;  %v1007_v30 = vmax.f32 %v1002_v24, 0.0 }
 0x532   : > { %v1031_v31 = vmul.f32 %v1026_v15, %v1011_v27 }
 0x534   : > { %v1035_v1 = vadd.f32 %v1031_v31, %v1007_v30 }
 0x536   : > { %1057 = vmatpush.msra.mxu0 %v1035_v1 }
 0x538   : > { %1058 = vmatpush.msra.mxu0 %v1034_v35 }
 0x53a   : > { %1059 = vmatpush.msra.mxu0 %v1033_v37 }
 0x53c   : > { %1060 = vmatpush.msra.mxu0 %v1032_v38 }
 0x53d   : > { %1201 = vmatmul.msk.f32.vlgmr.msra.gmra.mxu0 %vm1042_vm2, %v1036_v6 }
 0x5ba   : > { %v1062_v41 = vpop.f32.mrf.mxu0 }
 0x5bb   : > { %v1063_v42 = vadd.f32 %v1062_v41, %v1040_v40 }
 0x5bd   : > { %v1066_v44 = vrot.slane %v1063_v42, 1 }
 0x5bf   : > { %v1068_v46 = vsub.f32 %v1063_v42, %v1066_v44 }
 0x5c1   : > { %v1069_v47 = vmul.f32 1.442695, %v1068_v46 }
 0x5c3   : > { %1369 = vpow2.f32 %v1069_v47 }
 0x5c9   : > { %v1370_v48 = vpop.eup %1369 }
 0x5ca   : > { %v1071_v51 = vadd.f32 1.0, %v1370_v48 }
 0x5cc   : > { %1371 = vrcp.f32 %v1071_v51  ;;  %v1083_v55 = vand.u32 2147483648, %v1071_v51  ;;  %v1081_v57 = vand.u32 2147483647, %v1071_v51  ;;  %vm1077_vm7 = vweird.f32 %v1071_v51 }
 0x5ce   : > { %v1084_v59 = vor.u32 1.1754944e-38, %v1083_v55  ;;  %vm1082_vm9 = vcmp.eq.f32.partialorder %v1081_v57, 8.507059e+37 }
 0x5d2   : > { %v1372_v52 = vpop.eup %1371 }
 0x5d3   : > { %v1073_v53 = vmul.f32 %v1372_v52, %v1071_v51  ;;  %vm1078_vm6 = vweird.f32 %v1372_v52 }
 0x5d4   : > { %vm1079_vm8 = vmor %vm1077_vm7, %vm1078_vm6 }
 0x5d5   : > { %v1074_v54 = vsub.f32 1.0, %v1073_v53 }
 0x5d7   : > { %v1075_v56 = vmul.f32 %v1372_v52, %v1074_v54 }
 0x5d9   : > { %v1076_v58 = vadd.f32 %v1372_v52, %v1075_v56 }
 0x5db   : > { %v1080_v60 = vsel %vm1079_vm8, %v1372_v52, %v1076_v58 }
 0x5dc   : > { %v1085_v61 = vsel %vm1082_vm9, %v1084_v59, %v1080_v60 }
 0x5dd   : > { %v1087_v62 = vsub.f32 1.0, %v1085_v61  ;;  %v1089_v63 = vrot.slane %v1085_v61, 7 }
 0x5df   : > { %v1091_v0 = vsel %vm421_vm11, %v1063_v42, %v1087_v62 }
 0x5e0   : > { %v1092_v49 = vsel %vm430_vm5, %v1091_v0, %v1089_v63 }
 0x5e1   : > { %1203 = vmatmul.msk.f32.vlgmr.msrb.gmra.mxu2 %vm592_vm0, %v1092_v49 }
 0x664   : > { %v1119_v3 = vpop.f32.mrf.mxu2 }
 0x665   : > { %1123 = vst.msk [vmem:[%s303_s17] sm:$0x3f] %vm1122_vm10, %v1119_v3 }
 0x666 PF: > { %s18_s27 = sadd.s32 1, %s1379_s27  }
 0x667   : > { %p15_p4 = scmp.ge.s32.totalorder %s18_s27, 4  }
 0x669   :  { %17 = sbr.rel (!%p15_p4) target bundleno = 1 (0x1), region = 83 }

</bundles_post_ra>
